<compile_context>
chip_gen: v5e
topology: v5e:2x2
jax: 0.10.0
libtpu: 0.0.40
codegen_flags: <defaults>
</compile_context>

<pallas_src>
import jax
import jax.numpy as jnp
from jax.experimental import pallas as pl
from jax.experimental.pallas import tpu as pltpu


# ---- "opts" constants (deterministic, in-script; no checkpoint) -----------------------
PAD_TOKEN = 0
KEYWORD_TOKEN = 5
KEYWORD_APPROACHES = ("ktoken",)
IS_VARIATIONAL_AUTOREGRESSIVE = True
BOW_WINDOW = None   # -> the unsqueeze/repeat/masked_fill path of get_bow_tgt


# ------------------------------ small helpers ------------------------------------------
def _ceil_to(x, m):
    return ((x + m - 1) // m) * m


def _tpu_generation():
    """Best-effort TPU generation from device_kind; 0 if unknown."""
    try:
        kind = jax.devices()[0].device_kind.lower()
    except Exception:
        return 0
    for g in (7, 6, 5, 4):
        if f"v{g}" in kind:
            return g
    return 0


def _bow_vmem_config():
    """(budget for double-buffered bow blocks, vmem_limit_bytes or None)."""
    gen = _tpu_generation()
    if gen == 0:
        return 8 << 20, None            # unknown chip: conservative, keep default limit
    if gen >= 7:
        return 20 << 20, 48 << 20       # v7x: 64 MiB physical VMEM, 32 MiB scoped default
    return 48 << 20, 100 << 20          # v4/v5e/v6e: 128 MiB physical VMEM


# ------------------------------ Pallas kernels -----------------------------------------
def _real_tgt_kernel(tgt_ref, kw_ref, real_ref):
    """masked_fill(tgt == keyword_ids, KEYWORD_token), native (TILE_S, B) layout."""
    tgt = tgt_ref[...]                                  # (TILE_S, B)
    real_ref[...] = jnp.where(tgt == kw_ref[...], KEYWORD_TOKEN, tgt)


def _pad_mask_kernel(tgt_ref, pad_ref):
    """(tgt == PAD_token) as int8, native (TILE_S, B) layout (pre-transpose)."""
    pad_ref[...] = (tgt_ref[...] == PAD_TOKEN).astype(jnp.int8)


def _real_pad_kernel(tgt_ref, kw_ref, real_ref, pad_ref):
    """Fused: one read of tgt, two outputs (masked-filled tgt + int8 padding mask)."""
    tgt = tgt_ref[...]                                  # (TILE_S, B)
    real_ref[...] = jnp.where(tgt == kw_ref[...], KEYWORD_TOKEN, tgt)
    pad_ref[...] = (tgt == PAD_TOKEN).astype(jnp.int8)


def _make_bow_kernel(batch):
    """Bag-of-words kernel on the flattened, sublane/lane-dense 2D layout.

    tgt_ref : (TILE_R, 1)  where TILE_R = TILE_I * batch; row r = i*batch + b holds tgt[i, b]
    bow_ref : (TILE_R, S)  bow[r, j] = PAD if j > i else tgt[i, b]   (i = r // batch)

    The condition "j > r // batch" is rewritten as "j*batch > r", avoiding an integer
    division per element.
    """
    def kernel(tgt_ref, bow_ref):
        tile_r, s = bow_ref.shape
        base_r = pl.program_id(0) * tile_r
        r = base_r + jax.lax.broadcasted_iota(jnp.int32, (tile_r, s), 0)    # global flat row
        j_scaled = jax.lax.broadcasted_iota(jnp.int32, (tile_r, s), 1) * batch
        future = j_scaled > r                                               # j > i (strict)
        bow_ref[...] = jnp.where(future, PAD_TOKEN, tgt_ref[...])           # lane broadcast
    return kernel


# ------------------------------ tile choosers ------------------------------------------
def _pick_sublane_tile(s, row_budget=2048):
    """Sublane-axis tile for the (S, B) kernels.  Full S (always layout-legal) when small;
    otherwise the largest divisor of S that is a multiple of 32 (legal for int8 & int32)."""
    if s <= row_budget:
        return s
    t = (row_budget // 32) * 32
    while t >= 32:
        if s % t == 0:
            return t
        t -= 32
    return s


def _bow_block_bytes(tile_r, s):
    """Double-buffered VMEM footprint of one grid step of the bow kernel, accounting for
    (8, 128) tile padding of both the (TILE_R, S) int32 out block and the (TILE_R, 1) in
    block (B < 8 sublane padding is already absorbed because i and b share the sublane
    axis, but TILE_R and S are still rounded up)."""
    out_b = _ceil_to(tile_r, 8) * _ceil_to(s, 128) * 4
    in_b = _ceil_to(tile_r, 8) * 128 * 4
    return 2 * (out_b + in_b)


def _pick_row_tile(s, b, vmem_budget_bytes):
    """Row tile TILE_I for the bow kernel.  TILE_I divides S; TILE_R = TILE_I*b is a
    multiple of 8 (or the full S*b); the double-buffered blocks fit the padded-aware
    budget; and >= 2 grid steps are preferred (v7x megacore sharding of the row axis)."""
    full_r = s * b

    def ok(tile_i):
        tile_r = tile_i * b
        if tile_r != full_r and tile_r % 8 != 0:
            return False
        return _bow_block_bytes(tile_r, s) <= vmem_budget_bytes

    divisors = [d for d in range(1, s + 1) if s % d == 0]
    capped = [d for d in divisors if d <= max(1, s // 2)]   # prefer >= 2 grid steps
    for cand in (sorted(capped, reverse=True), sorted(divisors, reverse=True)):
        for d in cand:
            if ok(d):
                return d
    return s   # fallback: single full tile (layout-legal; only hit for extreme shapes)


# ------------------------------ wrappers ------------------------------------------------
def real_tgt_pallas(tgt, keyword_ids):
    """tgt: (S, B) int, keyword_ids: (B,) int  ->  (S, B) masked-filled, same dtype."""
    S, B = tgt.shape
    kw = keyword_ids.astype(tgt.dtype).reshape(1, B)
    tile_s = _pick_sublane_tile(S)
    return pl.pallas_call(
        _real_tgt_kernel,
        out_shape=jax.ShapeDtypeStruct((S, B), tgt.dtype),
        grid=(S // tile_s,),
        in_specs=[pl.BlockSpec((tile_s, B), lambda i: (i, 0)),
                  pl.BlockSpec((1, B), lambda i: (0, 0))],
        out_specs=pl.BlockSpec((tile_s, B), lambda i: (i, 0)),
        compiler_params=pltpu.CompilerParams(dimension_semantics=("parallel",)),
    )(tgt, kw)


def padding_mask_pallas(tgt):
    """tgt: (S, B) int  ->  (S, B) int8  (== tgt == PAD, pre-transpose orientation)."""
    S, B = tgt.shape
    tile_s = _pick_sublane_tile(S)
    return pl.pallas_call(
        _pad_mask_kernel,
        out_shape=jax.ShapeDtypeStruct((S, B), jnp.int8),
        grid=(S // tile_s,),
        in_specs=[pl.BlockSpec((tile_s, B), lambda i: (i, 0))],
        out_specs=pl.BlockSpec((tile_s, B), lambda i: (i, 0)),
        compiler_params=pltpu.CompilerParams(dimension_semantics=("parallel",)),
    )(tgt)


def real_and_pad_pallas(tgt, keyword_ids):
    """Fused launch: one read of tgt, two outputs ((S, B) real_tgt, (S, B) int8 pad)."""
    S, B = tgt.shape
    kw = keyword_ids.astype(tgt.dtype).reshape(1, B)
    tile_s = _pick_sublane_tile(S)
    return pl.pallas_call(
        _real_pad_kernel,
        out_shape=(jax.ShapeDtypeStruct((S, B), tgt.dtype),
                   jax.ShapeDtypeStruct((S, B), jnp.int8)),
        grid=(S // tile_s,),
        in_specs=[pl.BlockSpec((tile_s, B), lambda i: (i, 0)),
                  pl.BlockSpec((1, B), lambda i: (0, 0))],
        out_specs=(pl.BlockSpec((tile_s, B), lambda i: (i, 0)),
                   pl.BlockSpec((tile_s, B), lambda i: (i, 0))),
        compiler_params=pltpu.CompilerParams(dimension_semantics=("parallel",)),
    )(tgt, kw)


def bow_tgt_lane_dense(tgt):
    """tgt: (S, B) int  ->  (S, B, S), bow[i, b, j] = PAD if j > i else tgt[i, b].

    Kernel works on the row-major-equivalent 2D view: input (S*B, 1), output (S*B, S)
    with (TILE_I*B, S) blocks -> fully packed sublanes and full-lane stores; the
    wrapper reshapes (free) back to (S, B, S).  No minor-dim transpose anywhere."""
    S, B = tgt.shape
    budget, vmem_limit = _bow_vmem_config()
    tile_i = _pick_row_tile(S, B, budget)
    tile_r = tile_i * B
    tgt_flat = tgt.reshape(S * B, 1)                    # free row-major reshape

    cp_kwargs = dict(dimension_semantics=("parallel",))
    if vmem_limit is not None:
        cp_kwargs["vmem_limit_bytes"] = vmem_limit

    bow2d = pl.pallas_call(
        _make_bow_kernel(B),
        out_shape=jax.ShapeDtypeStruct((S * B, S), tgt.dtype),
        grid=(S // tile_i,),
        in_specs=[pl.BlockSpec((tile_r, 1), lambda i: (i, 0))],
        out_specs=pl.BlockSpec((tile_r, S), lambda i: (i, 0)),
        compiler_params=pltpu.CompilerParams(**cp_kwargs),
    )(tgt_flat)
    return bow2d.reshape(S, B, S)                       # free row-major reshape


# ------------------------------ module counterpart --------------------------------------
class ModelBasePallas:
    """JAX/Pallas counterpart of ModelBase's concrete utility methods."""

    PAD_token = PAD_TOKEN
    KEYWORD_token = KEYWORD_TOKEN

    # TODO(synk): abstract in the reference module — nothing to lower.
    def forward(self, *args, **kwargs):
        raise NotImplementedError

    def generate(self, *args, **kwargs):
        raise NotImplementedError

    def _reset_parameters(self, *args, **kwargs):
        raise NotImplementedError

    @staticmethod
    def _maybe_tile_keywords(tgt, keyword_ids, sample_n_to_check):
        if tgt.shape[1] != keyword_ids.shape[0]:
            assert tgt.shape[1] == keyword_ids.shape[0] * sample_n_to_check
            keyword_ids = jnp.tile(keyword_ids, sample_n_to_check)
        return keyword_ids

    def get_real_tgt(self, tgt, keyword_ids, sample_n_to_check=1):
        if keyword_ids is None:
            return tgt
        keyword_ids = self._maybe_tile_keywords(tgt, keyword_ids, sample_n_to_check)
        if "ktoken" in KEYWORD_APPROACHES:
            return real_tgt_pallas(tgt, keyword_ids)
        return tgt

    def get_bow_tgt(self, tgt, layout="sbs"):
        """Default layout is the lane-dense (S, B, S): bow[i, b, j].  layout='ssb' gives
        the drop-in PyTorch (S, S, B) layout at the cost of an extra O(S^2*B) transpose
        pass — only use it if the consumer cannot be adapted."""
        if not IS_VARIATIONAL_AUTOREGRESSIVE:
            return tgt
        if BOW_WINDOW is not None:
            # TODO(synk): bow_window parallelogram-gather path not lowered to Pallas.
            raise NotImplementedError
        bow_sbs = bow_tgt_lane_dense(tgt)
        if layout == "sbs":
            return bow_sbs
        assert layout == "ssb"
        return jnp.transpose(bow_sbs, (0, 2, 1))

    def _get_padding_mask(self, input, revise_for_khead=False, revise_for_cls=False):
        assert not (revise_for_khead and revise_for_cls)
        pad_sb = padding_mask_pallas(input)             # (S, B) int8, pre-transpose
        if revise_for_khead or revise_for_cls:
            zeros = jnp.zeros((1, pad_sb.shape[1]), dtype=pad_sb.dtype)
            pad_sb = jnp.concatenate([zeros, pad_sb], axis=0)
        # PyTorch contract: (..).t() -> (B, S[+1]); O(S*B) int8, negligible.
        return pad_sb.T.astype(jnp.bool_)

    def get_real_tgt_and_padding_mask(self, tgt, keyword_ids, sample_n_to_check=1,
                                      revise_for_khead=False, revise_for_cls=False):
        """Fused path: one launch, one read of tgt, for callers that need both."""
        assert not (revise_for_khead and revise_for_cls)
        if keyword_ids is None or "ktoken" not in KEYWORD_APPROACHES:
            return (self.get_real_tgt(tgt, keyword_ids, sample_n_to_check),
                    self._get_padding_mask(tgt, revise_for_khead, revise_for_cls))
        keyword_ids = self._maybe_tile_keywords(tgt, keyword_ids, sample_n_to_check)
        real_sb, pad_sb = real_and_pad_pallas(tgt, keyword_ids)
        if revise_for_khead or revise_for_cls:
            zeros = jnp.zeros((1, pad_sb.shape[1]), dtype=pad_sb.dtype)
            pad_sb = jnp.concatenate([zeros, pad_sb], axis=0)
        return real_sb, pad_sb.T.astype(jnp.bool_)


# ------------------------------ main -----------------------------------------------------
if __name__ == "__main__":
    S, B = 8, 2  # seq_len=8, batch=2

    key = jax.random.PRNGKey(0)
    k1, k2 = jax.random.split(key)
    tgt = jax.random.randint(k1, (S, B), 0, 20, dtype=jnp.int32)
    keyword_ids = jax.random.randint(k2, (B,), 1, 20, dtype=jnp.int32)
    # force at least one keyword match and one PAD so every branch is exercised
    tgt = tgt.at[3, 0].set(keyword_ids[0])
    tgt = tgt.at[S - 1, 1].set(PAD_TOKEN)

    model = ModelBasePallas()
    real_tgt = model.get_real_tgt(tgt, keyword_ids, sample_n_to_check=1)
    bow_sbs = model.get_bow_tgt(tgt)                      # default lane-dense (S, B, S)
    bow_ssb = model.get_bow_tgt(tgt, layout="ssb")        # PyTorch (S, S, B) compat check
    padding_mask = model._get_padding_mask(tgt)
    padding_mask_khead = model._get_padding_mask(tgt, revise_for_khead=True)
    real_fused, pad_fused = model.get_real_tgt_and_padding_mask(tgt, keyword_ids, 1)
    jax.block_until_ready((real_tgt, bow_sbs, bow_ssb, padding_mask,
                           padding_mask_khead, real_fused, pad_fused))

    # pure-JAX reference check (same semantics as the PyTorch methods)
    ref_real = jnp.where(tgt == keyword_ids[None, :], KEYWORD_TOKEN, tgt)
    tri = jnp.triu(jnp.ones((S, S), dtype=bool), k=1)
    ref_bow_sbs = jnp.where(tri[:, None, :], PAD_TOKEN, tgt[:, :, None])   # [i, b, j]
    ref_bow_ssb = jnp.where(tri[:, :, None], PAD_TOKEN, tgt[:, None, :])   # [i, j, b]
    ref_pad = (tgt == PAD_TOKEN).T
    ref_pad_khead = jnp.concatenate(
        [jnp.zeros((B, 1), dtype=jnp.bool_), ref_pad], axis=1)

    assert jnp.array_equal(real_tgt, ref_real)
    assert jnp.array_equal(bow_sbs, ref_bow_sbs)
    assert jnp.array_equal(bow_ssb, ref_bow_ssb)
    assert jnp.array_equal(padding_mask, ref_pad)
    assert jnp.array_equal(padding_mask_khead, ref_pad_khead)
    assert jnp.array_equal(real_fused, ref_real)
    assert jnp.array_equal(pad_fused, ref_pad)
    # keyword_ids=None path must fall through untouched (no Pallas call)
    assert jnp.array_equal(model.get_real_tgt(tgt, None, 1), tgt)

    print("KERNEL_OK")
</pallas_src>

<mosaic_0001>
module attributes {stable_mosaic.version = 11 : i64} {
  func.func @_real_tgt_kernel(%arg0: i32, %arg1: memref<8x2xi32, #tpu.memory_space<vmem>>, %arg2: memref<1x2xi32, #tpu.memory_space<vmem>>, %arg3: memref<8x2xi32, #tpu.memory_space<vmem>>) attributes {dimension_semantics = [#tpu.dimension_semantics<parallel>], iteration_bounds = array<i64: 1>, scalar_prefetch = 0 : i64, scratch_operands = 0 : i64, tpu.core_type = #tpu.core_type<tc>, window_params = [{transform_indices = @transform_0, window_bounds = array<i64: 8, 2>}, {pipeline_mode = #tpu.pipeline_mode<synchronous>, transform_indices = @transform_1, window_bounds = array<i64: 1, 2>}, {transform_indices = @transform_2, window_bounds = array<i64: 8, 2>}]} {
    %c0 = arith.constant 0 : index
    %c0_0 = arith.constant 0 : index
    %0 = vector.load %arg1[%c0, %c0_0] : memref<8x2xi32, #tpu.memory_space<vmem>>, vector<8x2xi32>
    %c0_1 = arith.constant 0 : index
    %c0_2 = arith.constant 0 : index
    %1 = vector.load %arg2[%c0_1, %c0_2] : memref<1x2xi32, #tpu.memory_space<vmem>>, vector<1x2xi32>
    %2 = vector.broadcast %1 : vector<1x2xi32> to vector<8x2xi32>
    %3 = arith.cmpi eq, %0, %2 : vector<8x2xi32>
    %c5_i32 = arith.constant 5 : i32
    %4 = vector.broadcast %c5_i32 : i32 to vector<8x2xi32>
    %5 = arith.select %3, %4, %0 : vector<8x2xi1>, vector<8x2xi32>
    %c0_3 = arith.constant 0 : index
    %c0_4 = arith.constant 0 : index
    %6 = vector.load %arg3[%c0_3, %c0_4] : memref<8x2xi32, #tpu.memory_space<vmem>>, vector<8x2xi32>
    tpu.vector_store %arg3[%c0_3, %c0_4], %5 {strides = array<i32>} : memref<8x2xi32, #tpu.memory_space<vmem>>, vector<8x2xi32>,
    return
  }
  func.func @transform_0(%arg0: i32) -> (i32, i32) {
    %c0_i32 = arith.constant 0 : i32
    %c0_i32_0 = arith.constant 0 : i32
    return %arg0, %c0_i32 : i32, i32
  }
  func.func @transform_1(%arg0: i32) -> (i32, i32) {
    %c0_i32 = arith.constant 0 : i32
    %c0_i32_0 = arith.constant 0 : i32
    %c0_i32_1 = arith.constant 0 : i32
    return %c0_i32, %c0_i32_0 : i32, i32
  }
  func.func @transform_2(%arg0: i32) -> (i32, i32) {
    %c0_i32 = arith.constant 0 : i32
    %c0_i32_0 = arith.constant 0 : i32
    return %arg0, %c0_i32 : i32, i32
  }
}

</mosaic_0001>

<bundles_post_ra>
// kernel: tpu_custom_call.1
= control target key start
LH: loop header
LB: loop body
LE: loop exit
PB: predicated region body
PF: predicated region fallthrough
CT: control target
= control target key end

     0   :  { %vm16_vm0 = vcmask 15360   ;;  %s47_s0 = inlined_call_operand.vmem [shape: s32[8,2], index: 0, kind: input, shape index: {}]   ;;  %s48_s1 = inlined_call_operand.vmem [shape: s32[1,2], index: 1, kind: input, shape index: {}]   ;;  %s49_s2 = inlined_call_operand.vmem [shape: s32[8,2], index: 2, kind: output, shape index: {}]  }
   0x1   :  { %v11_v0 = vld [vmem:[%s47_s0] sm:$0xff] }
   0x2   :  { %v22_v1 = vld [vmem:[%s48_s1] ss:$0 sm:$0xff] }
   0x3   :  { %vm14_vm1 = vcmp.eq.s32.totalorder %v11_v0, %v22_v1 }
   0x4   :  { %v15_v2 = vsel %vm14_vm1, 5, %v11_v0 }
   0x5   :  { %17 = vst.msk [vmem:[%s49_s2] sm:$0xff] %vm16_vm0, %v15_v2 }

</bundles_post_ra>
